<compile_context>
chip_gen: v7x
topology: tpu7x:2x2x1
jax: 0.10.0
libtpu: 0.0.40
codegen_flags: <defaults>
</compile_context>

<pallas_src>
import numpy as np
import jax
import jax.numpy as jnp
from jax.experimental import pallas as pl
from jax.experimental.pallas import tpu as pltpu


def _ghost_bn_kernel(eps):
    eps = float(eps)

    def kernel(x_ref, gamma_ref, beta_ref, o_ref):
        # x_ref: (G, C_TILE, HW); gamma_ref/beta_ref: (C_TILE, 1)
        x = x_ref[...]
        xf = x.astype(jnp.float32)                       # f32 accumulation
        g, _, hw = xf.shape
        inv_m = 1.0 / float(g * hw)

        # Per-channel mean: reduce the sample axis (leading-axis VPU adds)
        # then the spatial/lane axis (one XLU lane reduce).
        mean = jnp.sum(jnp.sum(xf, axis=0), axis=-1, keepdims=True) * inv_m  # (C,1)

        # Two-pass (numerically robust) biased variance.  The centered value
        # is only used inside the fused reduce, never in the output path.
        xc = xf - mean
        var = jnp.sum(jnp.sum(xc * xc, axis=0), axis=-1, keepdims=True) * inv_m

        inv_std = jax.lax.rsqrt(var + eps)                                   # (C,1)
        scale = gamma_ref[...].astype(jnp.float32) * inv_std                 # (C,1)
        shift = beta_ref[...].astype(jnp.float32) - mean * scale             # (C,1)

        # Single per-element FMA on the normalize pass: y = x*scale + shift.
        o_ref[...] = (xf * scale + shift).astype(o_ref.dtype)

    return kernel


def _pick_c_tile(C, G, HW, itemsize, budget_bytes):
    """Largest channel tile whose (G, C_TILE, HW) block fits the VMEM budget."""
    bytes_per_channel = G * HW * itemsize
    max_ct = max(1, budget_bytes // bytes_per_channel)
    if C <= max_ct or C <= 8:
        return C                                  # full channel dim, always legal
    # Tiled case: second-to-last block dim must be a multiple of 8.
    ct = max(8, (max_ct // 8) * 8)
    while ct > 8 and C % ct != 0:
        ct -= 8
    # TODO(synk): if even C_TILE=8 exceeds the budget (huge G*H*W), the
    # reduction axis should also be tiled with sum/sumsq accumulators.
    return ct


def ghost_batchnorm2d(x, gamma, beta, *, ghost_batch_size=32, eps=1e-5,
                      c_tile=None, vmem_budget_per_buffer=4 * 1024 * 1024):
    """Ghost BatchNorm2d forward (training statistics). x: (N, C, H, W)."""
    N, C, H, W = x.shape
    if N < ghost_batch_size:
        raise ValueError(
            f"Worker batch size {N} < ghost_batch_size {ghost_batch_size}")
    # TODO(synk): torch.chunk allows a smaller trailing chunk when
    # N % ghost_batch_size != 0; this kernel requires even chunks.
    assert N % ghost_batch_size == 0, "N must be divisible by ghost_batch_size"
    nchunks = N // ghost_batch_size
    G = ghost_batch_size
    HW = H * W

    # Free reshape (no data movement): (N, C, H, W) -> (nchunks, G, C, H*W).
    xr = x.reshape(nchunks, G, C, HW)

    if c_tile is None:
        c_tile = _pick_c_tile(C, G, HW, x.dtype.itemsize, vmem_budget_per_buffer)
    num_c_blocks = pl.cdiv(C, c_tile)

    gamma2 = gamma.reshape(C, 1).astype(jnp.float32)
    beta2 = beta.reshape(C, 1).astype(jnp.float32)

    out = pl.pallas_call(
        _ghost_bn_kernel(eps),
        out_shape=jax.ShapeDtypeStruct((nchunks, G, C, HW), x.dtype),
        grid_spec=pltpu.PrefetchScalarGridSpec(
            num_scalar_prefetch=0,
            grid=(nchunks, num_c_blocks),
            in_specs=[
                pl.BlockSpec((pl.Squeezed(), G, c_tile, HW),
                             lambda i, j: (i, 0, j, 0)),
                pl.BlockSpec((c_tile, 1), lambda i, j: (j, 0)),
                pl.BlockSpec((c_tile, 1), lambda i, j: (j, 0)),
            ],
            out_specs=pl.BlockSpec((pl.Squeezed(), G, c_tile, HW),
                                   lambda i, j: (i, 0, j, 0)),
        ),
        compiler_params=pltpu.CompilerParams(
            dimension_semantics=("parallel", "parallel"),
            vmem_limit_bytes=32 * 1024 * 1024),
    )(xr, gamma2, beta2)

    # Free reshape back to NCHW (no data movement).
    return out.reshape(N, C, H, W)


def _reference(x, gamma, beta, ghost_batch_size, eps):
    """Pure-JAX reference mirroring the torch module's forward."""
    N, C, H, W = x.shape
    nchunks = N // ghost_batch_size
    outs = []
    for chunk in jnp.split(x, nchunks, axis=0):
        mean = chunk.mean(axis=(0, 2, 3), keepdims=True)
        var = chunk.var(axis=(0, 2, 3), keepdims=True)          # biased
        yhat = (chunk - mean) / jnp.sqrt(var + eps)
        outs.append(yhat * gamma.reshape(1, C, 1, 1) + beta.reshape(1, C, 1, 1))
    return jnp.concatenate(outs, axis=0)


if __name__ == "__main__":
    key = jax.random.PRNGKey(0)
    eps = 1e-5
    ghost_batch_size = 32

    # Test 1: full-channel block (C fits in one tile), lane-dense HW=256.
    N, C, H, W = 64, 8, 16, 16          # 2 ghost chunks of size 32
    kx, key = jax.random.split(key)
    x = jax.random.normal(kx, (N, C, H, W), dtype=jnp.float32)
    gamma = 1.0 + 0.1 * jnp.arange(C, dtype=jnp.float32)
    beta = 0.05 * jnp.arange(C, dtype=jnp.float32) - 0.1

    y = ghost_batchnorm2d(x, gamma, beta,
                          ghost_batch_size=ghost_batch_size, eps=eps)
    y = jax.block_until_ready(y)
    y_ref = _reference(x, gamma, beta, ghost_batch_size, eps)
    np.testing.assert_allclose(np.asarray(y), np.asarray(y_ref),
                               rtol=1e-5, atol=1e-5)

    # Test 2: force the channel-tiled path (C=16 split into two 8-channel blocks).
    N2, C2, H2, W2 = 64, 16, 8, 8
    kx, key = jax.random.split(key)
    x2 = jax.random.normal(kx, (N2, C2, H2, W2), dtype=jnp.float32)
    gamma2 = 1.0 + 0.05 * jnp.arange(C2, dtype=jnp.float32)
    beta2 = 0.02 * jnp.arange(C2, dtype=jnp.float32) - 0.3

    y2 = ghost_batchnorm2d(x2, gamma2, beta2,
                           ghost_batch_size=ghost_batch_size, eps=eps,
                           c_tile=8)
    y2 = jax.block_until_ready(y2)
    y2_ref = _reference(x2, gamma2, beta2, ghost_batch_size, eps)
    np.testing.assert_allclose(np.asarray(y2), np.asarray(y2_ref),
                               rtol=1e-5, atol=1e-5)

    print("KERNEL_OK")
</pallas_src>

<mosaic_0001>
module attributes {stable_mosaic.version = 11 : i64} {
  func.func @kernel(%arg0: i32, %arg1: i32, %arg2: memref<1x32x8x256xf32, #tpu.memory_space<vmem>>, %arg3: memref<8x1xf32, #tpu.memory_space<vmem>>, %arg4: memref<8x1xf32, #tpu.memory_space<vmem>>, %arg5: memref<1x32x8x256xf32, #tpu.memory_space<vmem>>) attributes {dimension_semantics = [#tpu.dimension_semantics<parallel>, #tpu.dimension_semantics<parallel>], iteration_bounds = array<i64: 2, 1>, scalar_prefetch = 0 : i64, scratch_operands = 0 : i64, tpu.core_type = #tpu.core_type<tc>, window_params = [{transform_indices = @transform_0, window_bounds = array<i64: 1, 32, 8, 256>}, {transform_indices = @transform_1, window_bounds = array<i64: 8, 1>}, {transform_indices = @transform_2, window_bounds = array<i64: 8, 1>}, {transform_indices = @transform_3, window_bounds = array<i64: 1, 32, 8, 256>}]} {
    %c0 = arith.constant 0 : index
    %c0_0 = arith.constant 0 : index
    %c0_1 = arith.constant 0 : index
    %c0_2 = arith.constant 0 : index
    %0 = vector.load %arg2[%c0, %c0_0, %c0_1, %c0_2] : memref<1x32x8x256xf32, #tpu.memory_space<vmem>>, vector<1x32x8x256xf32>
    %1 = vector.shape_cast %0 : vector<1x32x8x256xf32> to vector<32x8x256xf32>
    %cst = arith.constant dense<0.000000e+00> : vector<8x256xf32>
    %2 = vector.multi_reduction <add>, %1, %cst [0] : vector<32x8x256xf32> to vector<8x256xf32>
    %cst_3 = arith.constant dense<0.000000e+00> : vector<8xf32>
    %3 = vector.multi_reduction <add>, %2, %cst_3 [1] : vector<8x256xf32> to vector<8xf32>
    %4 = vector.shape_cast %3 : vector<8xf32> to vector<8x1xf32>
    %cst_4 = arith.constant 1.22070313E-4 : f32
    %5 = vector.broadcast %cst_4 : f32 to vector<8x1xf32>
    %6 = arith.mulf %4, %5 : vector<8x1xf32>
    %7 = vector.shape_cast %6 : vector<8x1xf32> to vector<1x8x1xf32>
    %8 = vector.broadcast %7 : vector<1x8x1xf32> to vector<32x8x256xf32>
    %9 = arith.subf %1, %8 : vector<32x8x256xf32>
    %10 = arith.mulf %9, %9 : vector<32x8x256xf32>
    %cst_5 = arith.constant dense<0.000000e+00> : vector<8x256xf32>
    %11 = vector.multi_reduction <add>, %10, %cst_5 [0] : vector<32x8x256xf32> to vector<8x256xf32>
    %cst_6 = arith.constant dense<0.000000e+00> : vector<8xf32>
    %12 = vector.multi_reduction <add>, %11, %cst_6 [1] : vector<8x256xf32> to vector<8xf32>
    %13 = vector.shape_cast %12 : vector<8xf32> to vector<8x1xf32>
    %cst_7 = arith.constant 1.22070313E-4 : f32
    %14 = vector.broadcast %cst_7 : f32 to vector<8x1xf32>
    %15 = arith.mulf %13, %14 : vector<8x1xf32>
    %cst_8 = arith.constant 9.99999974E-6 : f32
    %16 = vector.broadcast %cst_8 : f32 to vector<8x1xf32>
    %17 = arith.addf %15, %16 : vector<8x1xf32>
    %18 = math.rsqrt %17 : vector<8x1xf32>
    %c0_9 = arith.constant 0 : index
    %c0_10 = arith.constant 0 : index
    %19 = vector.load %arg3[%c0_9, %c0_10] : memref<8x1xf32, #tpu.memory_space<vmem>>, vector<8x1xf32>
    %20 = arith.mulf %19, %18 : vector<8x1xf32>
    %c0_11 = arith.constant 0 : index
    %c0_12 = arith.constant 0 : index
    %21 = vector.load %arg4[%c0_11, %c0_12] : memref<8x1xf32, #tpu.memory_space<vmem>>, vector<8x1xf32>
    %22 = arith.mulf %6, %20 : vector<8x1xf32>
    %23 = arith.subf %21, %22 : vector<8x1xf32>
    %24 = vector.shape_cast %20 : vector<8x1xf32> to vector<1x8x1xf32>
    %25 = vector.broadcast %24 : vector<1x8x1xf32> to vector<32x8x256xf32>
    %26 = arith.mulf %1, %25 : vector<32x8x256xf32>
    %27 = vector.shape_cast %23 : vector<8x1xf32> to vector<1x8x1xf32>
    %28 = vector.broadcast %27 : vector<1x8x1xf32> to vector<32x8x256xf32>
    %29 = arith.addf %26, %28 : vector<32x8x256xf32>
    %c0_13 = arith.constant 0 : index
    %c0_14 = arith.constant 0 : index
    %c0_15 = arith.constant 0 : index
    %c0_16 = arith.constant 0 : index
    %30 = vector.load %arg5[%c0_13, %c0_14, %c0_15, %c0_16] : memref<1x32x8x256xf32, #tpu.memory_space<vmem>>, vector<1x32x8x256xf32>
    %31 = vector.shape_cast %30 : vector<1x32x8x256xf32> to vector<32x8x256xf32>
    %32 = vector.shape_cast %29 : vector<32x8x256xf32> to vector<1x32x8x256xf32>
    tpu.vector_store %arg5[%c0_13, %c0_14, %c0_15, %c0_16], %32 {strides = array<i32>} : memref<1x32x8x256xf32, #tpu.memory_space<vmem>>, vector<1x32x8x256xf32>,
    return
  }
  func.func @transform_0(%arg0: i32, %arg1: i32) -> (i32, i32, i32, i32) {
    %c0_i32 = arith.constant 0 : i32
    %c0_i32_0 = arith.constant 0 : i32
    %c0_i32_1 = arith.constant 0 : i32
    return %arg0, %c0_i32, %arg1, %c0_i32_0 : i32, i32, i32, i32
  }
  func.func @transform_1(%arg0: i32, %arg1: i32) -> (i32, i32) {
    %c0_i32 = arith.constant 0 : i32
    %c0_i32_0 = arith.constant 0 : i32
    return %arg1, %c0_i32 : i32, i32
  }
  func.func @transform_2(%arg0: i32, %arg1: i32) -> (i32, i32) {
    %c0_i32 = arith.constant 0 : i32
    %c0_i32_0 = arith.constant 0 : i32
    return %arg1, %c0_i32 : i32, i32
  }
  func.func @transform_3(%arg0: i32, %arg1: i32) -> (i32, i32, i32, i32) {
    %c0_i32 = arith.constant 0 : i32
    %c0_i32_0 = arith.constant 0 : i32
    %c0_i32_1 = arith.constant 0 : i32
    return %arg0, %c0_i32, %arg1, %c0_i32_0 : i32, i32, i32, i32
  }
}

</mosaic_0001>

<bundles_post_ra>
// kernel: tpu_custom_call.1
= control target key start
LH: loop header
LB: loop body
LE: loop exit
PB: predicated region body
PF: predicated region fallthrough
CT: control target
= control target key end

     0   :  { %8 = vsyncpa [#allocation3], 0  ;;  %s2167_s0 = inlined_call_operand.hbm [shape: f32[2,32,8,256], index: 0, kind: input, shape index: {}]   ;;  %s2168_s1 = inlined_call_operand.vmem [shape: f32[8,1], index: 1, kind: input, shape index: {}]   ;;  %s2169_s2 = inlined_call_operand.vmem [shape: f32[8,1], index: 2, kind: input, shape index: {}]   ;;  %s2170_s3 = inlined_call_operand.hbm [shape: f32[2,32,8,256], index: 3, kind: output, shape index: {}]  }
   0x1   :  { %10 = vsyncpa [#allocation3 + $0x1], 0 }
   0x2   :  { %11 = vsyncpa [#allocation4], 0 }
   0x3   :  { %13 = vsyncpa [#allocation4 + $0x1], 0  ;;  %s1138_s12 = smov 0   ;;  %s1140_s13 = smov 0  }
   0x4   :  { %s1142_s14 = smov 0   ;;  %s1144_s15 = smov 0  }
   0x5   :  { %s1146_s16 = smov 0   ;;  %s1148_s17 = smov 0  }
   0x6 LB: > { %s907_s18 = sadd.s32 4294967295, %s1109_s17   ;;  %s908_s19 = sadd.s32 4294967294, %s1109_s17   ;;  %s1109_s17 = sphi %s1148_s17, %s19_s17   ;;  %s1105_s16 = sphi %s1146_s16, %s2319_s16   ;;  %s1101_s15 = sphi %s1144_s15, %s2318_s15   ;;  %s1097_s14 = sphi %s1142_s14, %s2317_s14   ;;  %s1093_s13 = sphi %s1140_s13, %s2316_s13   ;;  %s1089_s12 = sphi %s1138_s12, %s2315_s12  }
   0x7   : > { %s31_s20 = sadd.s32 1, %s1105_s16  ;;  %s40_s21 = sadd.s32 1, %s1097_s14 }
   0x8   : > { %p33_p0 = scmp.ge.s32.totalorder %s31_s20, 2  ;;  %p47_p1 = scmp.ne.s32.totalorder %s1097_s14, %s1093_s13 }
   0x9   : > { %p48_p2 = scmp.eq.s32.totalorder %s1109_s17, 0  ;;  %p53_p3 = scmp.ne.s32.totalorder %s1093_s13, %s1089_s12 }
   0xa   : > { %s2321_s20 = smov (%p33_p0, %s31_s20), 0  ;;  %p54_p5 = scmp.eq.s32.totalorder %s907_s18, 0 }
   0xb   : > { %p1179_p4 = por %p48_p2, %p47_p1  ;;  %s35_s23 = ssub.s32 %s1105_s16, %s2321_s20 }
   0xc   : > { %p131_p6 = scmp.eq.s32.totalorder %s907_s18, 1  ;;  %p38_p7 = scmp.eq.s32.totalorder %s35_s23, 0 }
   0xd   : > { %p1185_p8 = por %p54_p5, %p53_p3  ;;  %p137_p10 = scmp.eq.s32.totalorder %s908_s19, 1 }
   0xe   : > { %p1189_p9 = por %p131_p6, %p47_p1  ;;  %p938_p13 = scmp.lt.s32.totalorder %s1109_s17, 2 }
   0xf   : > { %s1194_s26 = scalar_select %p38_p7, %s1097_s14, %s40_s21  }
  0x10   : > { %s2218_s25 = scalar_select %p1189_p9, 1, 0 }
  0x11   : > { %p1196_p11 = por %p137_p10, %p53_p3  ;;  %s171_s28 = sand.u32 1, %s1097_s14  }
  0x12   : > { %s913_s29 = sshll.u32 %s171_s28, 9  ;;  %s924_s30 = sshll.u32 %s1105_s16, 13 }
  0x13   : > { %s2219_s27 = scalar_select %p1196_p11, 1, 0 }
  0x14   : > { %s1207_s6 = scalar_lea.hbm %s2167_s0, %s924_s30  ;;  %s175_s7 = scalar_lea.vmem [#allocation2], %s913_s29 }
  0x15   : > { %s184_s8 = sshll.u32 %s175_s7, 4  ;;  %p1213_p0 = pnand %p938_p13, %p1179_p4  ;;  %s1209_s8 = int_to_ptr.vmem [resolvable:$true] %s184_s8 }
  0x16   : > { %s1218_s10 = scalar_lea.sflag [#allocation3], %s171_s28  ;;  %s997_s11 = scalar_lea.hbm %s1207_s6, 8192 }
  0x17   : > { %p998_p2 = scmp.ne.s32.totalorder %s1207_s6, %s997_s11  ;;  %p999_p3 = pneg %p1213_p0 }
  0x18   : > { %s1002_s21 = scalar_lea.hbm %s2167_s0, 16384  ;;  %p1003_p4 = scmp.lt.u32.totalorder %s1207_s6, %s2167_s0 }
  0x19   : > { %p1000_p5 = pnand %p999_p3, %p998_p2  ;;  %p1004_p7 = scmp.lt.u32.totalorder %s1002_s21, %s997_s11 }
  0x1a   : > { %p1006_p13 = scmp.lt.u32.totalorder %s997_s11, %s1207_s6 }
  0x1b   : > { %p1001_p6 = pneg %p1000_p5  ;;  %p1005_p10 = por %p1004_p7, %p1003_p4 }
  0x1d   : > { %p1007_p12 = por %p1006_p13, %p1005_p10 }
  0x1f   : > { %p1008_p1 = pnand %p1007_p12, %p1001_p6 }
  0x21   : > { %1011 = shalt.err (!%p1008_p1)
}
  0x22   : > { %s1012_s28 = scalar_lea.vmem %s1209_s8, 8192  ;;  %s1111_s29 = smov [#allocation2]  }
  0x23   : > { %p1013_p2 = scmp.ne.s32.totalorder %s1209_s8, %s1012_s28  ;;  %s1017_s30 = sshll.u32 %s1111_s29, 4  ;;  %s1018_s30 = int_to_ptr.vmem [resolvable:$false] %s1017_s30 }
  0x24   : > { %s1019_s4 = scalar_lea.vmem %s1018_s30, 16384  ;;  %p1020_p9 = scmp.lt.s32.totalorder %s1209_s8, %s1018_s30 }
  0x25   : > { %p1015_p5 = pnand %p1013_p2, %p999_p3  ;;  %p1021_p4 = scmp.lt.s32.totalorder %s1019_s4, %s1012_s28 }
  0x27   : > { %p1016_p11 = pneg %p1015_p5  ;;  %p1022_p7 = por %p1021_p4, %p1020_p9 }
  0x29   : > { %p1023_p10 = pnand %p1022_p7, %p1016_p11 }
  0x2b   : > { %1026 = shalt.err (!%p1023_p10)
}
  0x2c   : > { %s1112_s5 = smov 256   ;;  %s1113_s7 = smov 16  }
  0x2d   : > { %933 = dma.hbm_to_vmem [thread:$0]  (!%p1213_p0), %s1207_s6, 8192, %s1209_s8, %s1218_s10, %s1112_s5, %s1112_s5, %s1113_s7  }
  0x2e   : > { %p192_p12 = scmp.lt.s32.totalorder %s1109_s17, 3  ;;  %p2221_p1 = scmp.ge.s32.totalorder %s1109_s17, 1 }
  0x30   : > { %p193_p3 = pnand %p2221_p1, %p192_p12 }
  0x32   : > { %196 = sbr.rel (%p193_p3) target bundleno = 692 (0x2b4), region = 32 }
  0x39   : > { %s1250_s11 = sand.u32 1, %s1093_s13  }
  0x3a   : > { %s917_s18 = sshll.u32 %s1250_s11, 9  ;;  %s199_s19 = scalar_lea.sflag [#allocation3], %s1250_s11 }
  0x3b   : > { %s1256_s21 = scalar_lea.vmem [#allocation2], %s917_s18 }
  0x3c   : > { %1080 = dma.done.wait (%p1185_p8), %s199_s19, 8192  }
  0x3d   : > { %1082 = vsyncadd (%p1185_p8), %s199_s19, 4294959104  ;;  %v1263_v0 = vld [vmem:[%s1256_s21] sm:$0xff]  ;;  %v1266_v1 = vld [vmem:[%s1256_s21 + $0x8] sm:$0xff]  ;;  %s1941_s10 = scalar_lea.vmem [#allocation5], %s917_s18  ;;  %s925_s22 = sshll.u32 %s1101_s15, 13 }
  0x3e   : > { %2222 = vst [vmem:[#allocation8_spill] sm:$0xff] %v1263_v0  ;;  %2223 = vst [vmem:[#allocation9_spill] sm:$0xff] %v1266_v1  ;;  %v1269_v2 = vld [vmem:[%s1256_s21 + $0x10] sm:$0xff]  ;;  %v1272_v3 = vld [vmem:[%s1256_s21 + $0x18] sm:$0xff]  ;;  %s790_s23 = sshll.u32 %s1941_s10, 4  ;;  %s2096_s29 = scalar_lea.hbm %s2170_s3, %s925_s22  ;;  %s2098_s23 = int_to_ptr.vmem [resolvable:$true] %s790_s23 }
  0x3f   : > { %2224 = vst [vmem:[#allocation10_spill] sm:$0xff] %v1269_v2  ;;  %2225 = vst [vmem:[#allocation11_spill] sm:$0xff] %v1272_v3  ;;  %v1275_v4 = vld [vmem:[%s1256_s21 + $0x20] sm:$0xff]  ;;  %v1278_v5 = vld [vmem:[%s1256_s21 + $0x28] sm:$0xff]  ;;  %v305_v6 = vadd.f32 %v1269_v2, %v1263_v0  ;;  %v336_v8 = vadd.f32 %v1272_v3, %v1266_v1  ;;  %s775_s30 = scalar_lea.sflag [#allocation4], %s1250_s11  ;;  %s1027_s4 = scalar_lea.vmem %s2098_s23, 8192 }
  0x40   : > { %2226 = vst [vmem:[#allocation12_spill] sm:$0xff] %v1275_v4  ;;  %2227 = vst [vmem:[#allocation13_spill] sm:$0xff] %v1278_v5  ;;  %v1283_v7 = vld [vmem:[%s1256_s21 + $0x30] sm:$0xff]  ;;  %v1288_v9 = vld [vmem:[%s1256_s21 + $0x38] sm:$0xff]  ;;  %p1028_p8 = scmp.ne.s32.totalorder %s2098_s23, %s1027_s4  ;;  %p2312_p9 = scmp.ne.s32.totalorder %s2218_s25, 0 }
  0x41   : > { %2228 = vst [vmem:[#allocation14_spill] sm:$0xff] %v1283_v7  ;;  %2229 = vst [vmem:[#allocation15_spill] sm:$0xff] %v1288_v9  ;;  %v306_v10 = vadd.f32 %v305_v6, %v1275_v4  ;;  %v1292_v11 = vld [vmem:[%s1256_s21 + $0x40] sm:$0xff]  ;;  %v337_v12 = vadd.f32 %v336_v8, %v1278_v5  ;;  %v1296_v13 = vld [vmem:[%s1256_s21 + $0x48] sm:$0xff]  ;;  %s1115_s5 = smov [#allocation5]  }
  0x42   : > { %2230 = vst [vmem:[#allocation16_spill] sm:$0xff] %v1292_v11  ;;  %2231 = vst [vmem:[#allocation17_spill] sm:$0xff] %v1296_v13  ;;  %v1300_v15 = vld [vmem:[%s1256_s21 + $0x50] sm:$0xff]  ;;  %v1304_v17 = vld [vmem:[%s1256_s21 + $0x58] sm:$0xff]  ;;  %p1029_p11 = pnand %p1028_p8, %p2312_p9  ;;  %s1031_s7 = sshll.u32 %s1115_s5, 4  ;;  %s1032_s7 = int_to_ptr.vmem [resolvable:$false] %s1031_s7 }
  0x43   : > { %v307_v14 = vadd.f32 %v306_v10, %v1283_v7  ;;  %v338_v16 = vadd.f32 %v337_v12, %v1288_v9  ;;  %v1308_v19 = vld [vmem:[%s1256_s21 + $0x60] sm:$0xff]  ;;  %v1312_v21 = vld [vmem:[%s1256_s21 + $0x68] sm:$0xff]  ;;  %v1316_v23 = vld [vmem:[%s1256_s21 + $0x70] sm:$0xff]  ;;  %s1033_s18 = scalar_lea.vmem %s1032_s7, 16384  ;;  %p1034_p6 = scmp.lt.s32.totalorder %s2098_s23, %s1032_s7 }
  0x44   : > { %v1320_v25 = vld [vmem:[%s1256_s21 + $0x78] sm:$0xff]  ;;  %v1324_v27 = vld [vmem:[%s1256_s21 + $0x80] sm:$0xff]  ;;  %v1328_v29 = vld [vmem:[%s1256_s21 + $0x88] sm:$0xff]  ;;  %p1030_p0 = pneg %p1029_p11  ;;  %p1035_p13 = scmp.lt.s32.totalorder %s1033_s18, %s1027_s4 }
  0x45   : > { %v308_v18 = vadd.f32 %v307_v14, %v1292_v11  ;;  %v339_v20 = vadd.f32 %v338_v16, %v1296_v13  ;;  %v1332_v31 = vld [vmem:[%s1256_s21 + $0x90] sm:$0xff]  ;;  %v1336_v33 = vld [vmem:[%s1256_s21 + $0x98] sm:$0xff]  ;;  %v1340_v35 = vld [vmem:[%s1256_s21 + $0xa0] sm:$0xff] }
  0x46   : > { %v1344_v37 = vld [vmem:[%s1256_s21 + $0xa8] sm:$0xff]  ;;  %v1348_v39 = vld [vmem:[%s1256_s21 + $0xb0] sm:$0xff]  ;;  %v1352_v41 = vld [vmem:[%s1256_s21 + $0xb8] sm:$0xff]  ;;  %p1036_p2 = por %p1035_p13, %p1034_p6 }
  0x47   : > { %v309_v22 = vadd.f32 %v308_v18, %v1300_v15  ;;  %v340_v24 = vadd.f32 %v339_v20, %v1304_v17  ;;  %v1356_v43 = vld [vmem:[%s1256_s21 + $0xc0] sm:$0xff]  ;;  %v1360_v45 = vld [vmem:[%s1256_s21 + $0xc8] sm:$0xff]  ;;  %v1364_v47 = vld [vmem:[%s1256_s21 + $0xd0] sm:$0xff] }
  0x48   : > { %v1368_v49 = vld [vmem:[%s1256_s21 + $0xd8] sm:$0xff]  ;;  %v1372_v51 = vld [vmem:[%s1256_s21 + $0xe0] sm:$0xff]  ;;  %v1376_v53 = vld [vmem:[%s1256_s21 + $0xe8] sm:$0xff]  ;;  %p1037_p5 = pnand %p1036_p2, %p1030_p0 }
  0x49   : > { %v310_v26 = vadd.f32 %v309_v22, %v1308_v19  ;;  %v341_v28 = vadd.f32 %v340_v24, %v1312_v21  ;;  %v1380_v55 = vld [vmem:[%s1256_s21 + $0xf0] sm:$0xff]  ;;  %v1384_v57 = vld [vmem:[%s1256_s21 + $0xf8] sm:$0xff]  ;;  %v1388_v59 = vld [vmem:[%s1256_s21 + $0x100] sm:$0xff] }
  0x4a   : > { %v1392_v61 = vld [vmem:[%s1256_s21 + $0x108] sm:$0xff]  ;;  %v1396_v63 = vld [vmem:[%s1256_s21 + $0x110] sm:$0xff]  ;;  %v1400_v8 = vld [vmem:[%s1256_s21 + $0x118] sm:$0xff] }
  0x4b   : > { %v311_v30 = vadd.f32 %v310_v26, %v1316_v23  ;;  %v342_v32 = vadd.f32 %v341_v28, %v1320_v25  ;;  %v1404_v12 = vld [vmem:[%s1256_s21 + $0x120] sm:$0xff]  ;;  %v1408_v16 = vld [vmem:[%s1256_s21 + $0x128] sm:$0xff]  ;;  %v1412_v20 = vld [vmem:[%s1256_s21 + $0x130] sm:$0xff] }
  0x4c   : > { %v1416_v24 = vld [vmem:[%s1256_s21 + $0x138] sm:$0xff]  ;;  %v1420_v28 = vld [vmem:[%s1256_s21 + $0x140] sm:$0xff] }
  0x4d   : > { %v312_v34 = vadd.f32 %v311_v30, %v1324_v27  ;;  %v343_v36 = vadd.f32 %v342_v32, %v1328_v29  ;;  %v1424_v32 = vld [vmem:[%s1256_s21 + $0x148] sm:$0xff] }
  0x4f   : > { %v313_v38 = vadd.f32 %v312_v34, %v1332_v31  ;;  %v344_v40 = vadd.f32 %v343_v36, %v1336_v33  ;;  %v1428_v36 = vld [vmem:[%s1256_s21 + $0x150] sm:$0xff] }
  0x51   : > { %v314_v42 = vadd.f32 %v313_v38, %v1340_v35  ;;  %v345_v44 = vadd.f32 %v344_v40, %v1344_v37  ;;  %v1432_v40 = vld [vmem:[%s1256_s21 + $0x158] sm:$0xff] }
  0x52   : > { %2232 = vst [vmem:[#allocation18_spill] sm:$0xff] %v1432_v40 }
  0x53   : > { %v315_v46 = vadd.f32 %v314_v42, %v1348_v39  ;;  %v346_v48 = vadd.f32 %v345_v44, %v1352_v41  ;;  %v1436_v44 = vld [vmem:[%s1256_s21 + $0x160] sm:$0xff] }
  0x54   : > { %2233 = vst [vmem:[#allocation19_spill] sm:$0xff] %v1436_v44 }
  0x55   : > { %v316_v50 = vadd.f32 %v315_v46, %v1356_v43  ;;  %v347_v52 = vadd.f32 %v346_v48, %v1360_v45  ;;  %v1440_v48 = vld [vmem:[%s1256_s21 + $0x168] sm:$0xff] }
  0x56   : > { %2234 = vst [vmem:[#allocation20_spill] sm:$0xff] %v1440_v48 }
  0x57   : > { %v317_v54 = vadd.f32 %v316_v50, %v1364_v47  ;;  %v348_v56 = vadd.f32 %v347_v52, %v1368_v49  ;;  %v1444_v52 = vld [vmem:[%s1256_s21 + $0x170] sm:$0xff] }
  0x58   : > { %2235 = vst [vmem:[#allocation21_spill] sm:$0xff] %v1444_v52 }
  0x59   : > { %v318_v58 = vadd.f32 %v317_v54, %v1372_v51  ;;  %v349_v60 = vadd.f32 %v348_v56, %v1376_v53  ;;  %v1448_v56 = vld [vmem:[%s1256_s21 + $0x178] sm:$0xff] }
  0x5a   : > { %2236 = vst [vmem:[#allocation22_spill] sm:$0xff] %v1448_v56 }
  0x5b   : > { %v319_v62 = vadd.f32 %v318_v58, %v1380_v55  ;;  %v350_v6 = vadd.f32 %v349_v60, %v1384_v57  ;;  %v1452_v60 = vld [vmem:[%s1256_s21 + $0x180] sm:$0xff] }
  0x5c   : > { %2237 = vst [vmem:[#allocation23_spill] sm:$0xff] %v1452_v60 }
  0x5d   : > { %v320_v10 = vadd.f32 %v319_v62, %v1388_v59  ;;  %v351_v14 = vadd.f32 %v350_v6, %v1392_v61  ;;  %v1456_v6 = vld [vmem:[%s1256_s21 + $0x188] sm:$0xff] }
  0x5e   : > { %2238 = vst [vmem:[#allocation24_spill] sm:$0xff] %v1456_v6 }
  0x5f   : > { %v321_v18 = vadd.f32 %v320_v10, %v1396_v63  ;;  %v352_v22 = vadd.f32 %v351_v14, %v1400_v8  ;;  %v1460_v14 = vld [vmem:[%s1256_s21 + $0x190] sm:$0xff] }
  0x60   : > { %2239 = vst [vmem:[#allocation25_spill] sm:$0xff] %v1460_v14 }
  0x61   : > { %v322_v26 = vadd.f32 %v321_v18, %v1404_v12  ;;  %v353_v30 = vadd.f32 %v352_v22, %v1408_v16  ;;  %v1464_v22 = vld [vmem:[%s1256_s21 + $0x198] sm:$0xff] }
  0x62   : > { %2240 = vst [vmem:[#allocation26_spill] sm:$0xff] %v1464_v22 }
  0x63   : > { %v323_v34 = vadd.f32 %v322_v26, %v1412_v20  ;;  %v354_v38 = vadd.f32 %v353_v30, %v1416_v24  ;;  %v1468_v30 = vld [vmem:[%s1256_s21 + $0x1a0] sm:$0xff] }
  0x64   : > { %2241 = vst [vmem:[#allocation27_spill] sm:$0xff] %v1468_v30 }
  0x65   : > { %v324_v42 = vadd.f32 %v323_v34, %v1420_v28  ;;  %v355_v46 = vadd.f32 %v354_v38, %v1424_v32  ;;  %v1472_v38 = vld [vmem:[%s1256_s21 + $0x1a8] sm:$0xff] }
  0x66   : > { %2242 = vst [vmem:[#allocation28_spill] sm:$0xff] %v1472_v38 }
  0x67   : > { %v325_v50 = vadd.f32 %v324_v42, %v1428_v36  ;;  %v356_v54 = vadd.f32 %v355_v46, %v1432_v40  ;;  %v1476_v46 = vld [vmem:[%s1256_s21 + $0x1b0] sm:$0xff] }
  0x68   : > { %2243 = vst [vmem:[#allocation29_spill] sm:$0xff] %v1476_v46 }
  0x69   : > { %v326_v58 = vadd.f32 %v325_v50, %v1436_v44  ;;  %v357_v62 = vadd.f32 %v356_v54, %v1440_v48  ;;  %v1480_v54 = vld [vmem:[%s1256_s21 + $0x1b8] sm:$0xff] }
  0x6a   : > { %2244 = vst [vmem:[#allocation30_spill] sm:$0xff] %v1480_v54 }
  0x6b   : > { %v327_v10 = vadd.f32 %v326_v58, %v1444_v52  ;;  %v358_v18 = vadd.f32 %v357_v62, %v1448_v56  ;;  %v1484_v62 = vld [vmem:[%s1256_s21 + $0x1c0] sm:$0xff] }
  0x6c   : > { %2245 = vst [vmem:[#allocation31_spill] sm:$0xff] %v1484_v62 }
  0x6d   : > { %v328_v26 = vadd.f32 %v327_v10, %v1452_v60  ;;  %v359_v34 = vadd.f32 %v358_v18, %v1456_v6  ;;  %v1488_v18 = vld [vmem:[%s1256_s21 + $0x1c8] sm:$0xff]  ;;  %v1492_v60 = vld [vmem:[%s1256_s21 + $0x1d0] sm:$0xff] }
  0x6e   : > { %2246 = vst [vmem:[#allocation32_spill] sm:$0xff] %v1488_v18  ;;  %2247 = vst [vmem:[#allocation33_spill] sm:$0xff] %v1492_v60 }
  0x6f   : > { %v329_v42 = vadd.f32 %v328_v26, %v1460_v14  ;;  %v360_v50 = vadd.f32 %v359_v34, %v1464_v22  ;;  %v1496_v14 = vld [vmem:[%s1256_s21 + $0x1d8] sm:$0xff]  ;;  %v1500_v22 = vld [vmem:[%s1256_s21 + $0x1e0] sm:$0xff] }
  0x70   : > { %2248 = vst [vmem:[#allocation34_spill] sm:$0xff] %v1496_v14  ;;  %2249 = vst [vmem:[#allocation35_spill] sm:$0xff] %v1500_v22 }
  0x71   : > { %v330_v58 = vadd.f32 %v329_v42, %v1468_v30  ;;  %v361_v10 = vadd.f32 %v360_v50, %v1472_v38  ;;  %v1504_v30 = vld [vmem:[%s1256_s21 + $0x1e8] sm:$0xff]  ;;  %v1508_v38 = vld [vmem:[%s1256_s21 + $0x1f0] sm:$0xff] }
  0x72   : > { %2250 = vst [vmem:[#allocation36_spill] sm:$0xff] %v1504_v30  ;;  %2251 = vst [vmem:[#allocation37_spill] sm:$0xff] %v1508_v38 }
  0x73   : > { %v331_v6 = vadd.f32 %v330_v58, %v1476_v46  ;;  %v362_v26 = vadd.f32 %v361_v10, %v1480_v54  ;;  %v1512_v46 = vld [vmem:[%s1256_s21 + $0x1f8] sm:$0xff] }
  0x74   : > { %2252 = vst [vmem:[#allocation38_spill] sm:$0xff] %v1512_v46 }
  0x75   : > { %v332_v34 = vadd.f32 %v331_v6, %v1484_v62  ;;  %v363_v42 = vadd.f32 %v362_v26, %v1488_v18 }
  0x77   : > { %v333_v50 = vadd.f32 %v332_v34, %v1492_v60  ;;  %v364_v58 = vadd.f32 %v363_v42, %v1496_v14 }
  0x79   : > { %v334_v10 = vadd.f32 %v333_v50, %v1500_v22  ;;  %v365_v54 = vadd.f32 %v364_v58, %v1504_v30 }
  0x7b   : > { %v335_v6 = vadd.f32 %v334_v10, %v1508_v38  ;;  %v366_v62 = vadd.f32 %v365_v54, %v1512_v46 }
  0x7d   : > { %v367_v56 = vadd.f32 %v366_v62, %v335_v6 }
  0x7f   : > { %368 = vadd.xlane.f32.xlu0 %v367_v56 }
 0x10c   : > { %v369_v26 = vpop.xlane.xlu0 %368 }
 0x10d   : > { %v1518_v18 = vmul.f32 0.00012207031, %v369_v26 }
 0x10f   : > { %v371_v34 = vsub.f32 %v1263_v0, %v1518_v18  ;;  %v372_v42 = vsub.f32 %v1266_v1, %v1518_v18  ;;  %v373_v50 = vsub.f32 %v1269_v2, %v1518_v18  ;;  %v374_v58 = vsub.f32 %v1272_v3, %v1518_v18 }
 0x110   : > { %v375_v54 = vsub.f32 %v1275_v4, %v1518_v18  ;;  %v376_v56 = vsub.f32 %v1278_v5, %v1518_v18  ;;  %v377_v0 = vsub.f32 %v1283_v7, %v1518_v18  ;;  %v378_v1 = vsub.f32 %v1288_v9, %v1518_v18 }
 0x111   : > { %v435_v62 = vmul.f32 %v371_v34, %v371_v34  ;;  %v436_v10 = vmul.f32 %v372_v42, %v372_v42  ;;  %v437_v6 = vmul.f32 %v373_v50, %v373_v50  ;;  %v438_v26 = vmul.f32 %v374_v58, %v374_v58 }
 0x112   : > { %v379_v2 = vsub.f32 %v1292_v11, %v1518_v18  ;;  %v380_v3 = vsub.f32 %v1296_v13, %v1518_v18  ;;  %v439_v4 = vmul.f32 %v375_v54, %v375_v54  ;;  %v440_v46 = vmul.f32 %v376_v56, %v376_v56 }
 0x113   : > { %v499_v38 = vadd.f32 %v437_v6, %v435_v62  ;;  %v530_v5 = vadd.f32 %v438_v26, %v436_v10  ;;  %v381_v34 = vsub.f32 %v1300_v15, %v1518_v18  ;;  %v382_v42 = vsub.f32 %v1304_v17, %v1518_v18 }
 0x114   : > { %v441_v50 = vmul.f32 %v377_v0, %v377_v0  ;;  %v442_v58 = vmul.f32 %v378_v1, %v378_v1  ;;  %v383_v11 = vsub.f32 %v1308_v19, %v1518_v18  ;;  %v384_v13 = vsub.f32 %v1312_v21, %v1518_v18 }
 0x115   : > { %v500_v7 = vadd.f32 %v499_v38, %v439_v4  ;;  %v531_v9 = vadd.f32 %v530_v5, %v440_v46  ;;  %v443_v54 = vmul.f32 %v379_v2, %v379_v2  ;;  %v444_v56 = vmul.f32 %v380_v3, %v380_v3 }
 0x116   : > { %v385_v6 = vsub.f32 %v1316_v23, %v1518_v18  ;;  %v386_v26 = vsub.f32 %v1320_v25, %v1518_v18  ;;  %v445_v0 = vmul.f32 %v381_v34, %v381_v34  ;;  %v446_v1 = vmul.f32 %v382_v42, %v382_v42 }
 0x117   : > { %v501_v62 = vadd.f32 %v500_v7, %v441_v50  ;;  %v532_v10 = vadd.f32 %v531_v9, %v442_v58  ;;  %v387_v38 = vsub.f32 %v1324_v27, %v1518_v18  ;;  %v388_v46 = vsub.f32 %v1328_v29, %v1518_v18 }
 0x118   : > { %v447_v2 = vmul.f32 %v383_v11, %v383_v11  ;;  %v448_v3 = vmul.f32 %v384_v13, %v384_v13  ;;  %v389_v50 = vsub.f32 %v1332_v31, %v1518_v18  ;;  %v390_v58 = vsub.f32 %v1336_v33, %v1518_v18 }
 0x119   : > { %v502_v4 = vadd.f32 %v501_v62, %v443_v54  ;;  %v533_v5 = vadd.f32 %v532_v10, %v444_v56  ;;  %v449_v34 = vmul.f32 %v385_v6, %v385_v6  ;;  %v450_v42 = vmul.f32 %v386_v26, %v386_v26 }
 0x11a   : > { %v391_v62 = vsub.f32 %v1340_v35, %v1518_v18  ;;  %v392_v10 = vsub.f32 %v1344_v37, %v1518_v18  ;;  %v451_v11 = vmul.f32 %v387_v38, %v387_v38  ;;  %v452_v13 = vmul.f32 %v388_v46, %v388_v46 }
 0x11b   : > { %v503_v7 = vadd.f32 %v502_v4, %v445_v0  ;;  %v534_v9 = vadd.f32 %v533_v5, %v446_v1  ;;  %v393_v4 = vsub.f32 %v1348_v39, %v1518_v18  ;;  %v394_v5 = vsub.f32 %v1352_v41, %v1518_v18 }
 0x11c   : > { %v453_v6 = vmul.f32 %v389_v50, %v389_v50  ;;  %v454_v26 = vmul.f32 %v390_v58, %v390_v58  ;;  %v455_v38 = vmul.f32 %v391_v62, %v391_v62  ;;  %v456_v46 = vmul.f32 %v392_v10, %v392_v10 }
 0x11d   : > { %v504_v54 = vadd.f32 %v503_v7, %v447_v2  ;;  %v535_v56 = vadd.f32 %v534_v9, %v448_v3  ;;  %v395_v7 = vsub.f32 %v1356_v43, %v1518_v18  ;;  %v396_v9 = vsub.f32 %v1360_v45, %v1518_v18 }
 0x11e   : > { %v457_v50 = vmul.f32 %v393_v4, %v393_v4  ;;  %v458_v58 = vmul.f32 %v394_v5, %v394_v5 }
 0x11f   : > { %v505_v0 = vadd.f32 %v504_v54, %v449_v34  ;;  %v536_v1 = vadd.f32 %v535_v56, %v450_v42  ;;  %v397_v54 = vsub.f32 %v1364_v47, %v1518_v18  ;;  %v398_v56 = vsub.f32 %v1368_v49, %v1518_v18 }
 0x120   : > { %v459_v62 = vmul.f32 %v395_v7, %v395_v7  ;;  %v460_v10 = vmul.f32 %v396_v9, %v396_v9 }
 0x121   : > { %v506_v2 = vadd.f32 %v505_v0, %v451_v11  ;;  %v537_v3 = vadd.f32 %v536_v1, %v452_v13  ;;  %v399_v0 = vsub.f32 %v1372_v51, %v1518_v18  ;;  %v400_v1 = vsub.f32 %v1376_v53, %v1518_v18 }
 0x122   : > { %v461_v4 = vmul.f32 %v397_v54, %v397_v54  ;;  %v462_v5 = vmul.f32 %v398_v56, %v398_v56 }
 0x123   : > { %v507_v34 = vadd.f32 %v506_v2, %v453_v6  ;;  %v538_v42 = vadd.f32 %v537_v3, %v454_v26  ;;  %v401_v2 = vsub.f32 %v1380_v55, %v1518_v18  ;;  %v402_v3 = vsub.f32 %v1384_v57, %v1518_v18 }
 0x124   : > { %v463_v7 = vmul.f32 %v399_v0, %v399_v0  ;;  %v464_v9 = vmul.f32 %v400_v1, %v400_v1 }
 0x125   : > { %v508_v11 = vadd.f32 %v507_v34, %v455_v38  ;;  %v539_v13 = vadd.f32 %v538_v42, %v456_v46  ;;  %v403_v34 = vsub.f32 %v1388_v59, %v1518_v18  ;;  %v404_v42 = vsub.f32 %v1392_v61, %v1518_v18 }
 0x126   : > { %v465_v54 = vmul.f32 %v401_v2, %v401_v2  ;;  %v466_v56 = vmul.f32 %v402_v3, %v402_v3 }
 0x127   : > { %v509_v6 = vadd.f32 %v508_v11, %v457_v50  ;;  %v540_v26 = vadd.f32 %v539_v13, %v458_v58  ;;  %v405_v11 = vsub.f32 %v1396_v63, %v1518_v18  ;;  %v406_v13 = vsub.f32 %v1400_v8, %v1518_v18 }
 0x128   : > { %v467_v0 = vmul.f32 %v403_v34, %v403_v34  ;;  %v468_v1 = vmul.f32 %v404_v42, %v404_v42 }
 0x129   : > { %v510_v38 = vadd.f32 %v509_v6, %v459_v62  ;;  %v541_v46 = vadd.f32 %v540_v26, %v460_v10  ;;  %v407_v6 = vsub.f32 %v1404_v12, %v1518_v18  ;;  %v408_v26 = vsub.f32 %v1408_v16, %v1518_v18 }
 0x12a   : > { %v469_v2 = vmul.f32 %v405_v11, %v405_v11  ;;  %v470_v3 = vmul.f32 %v406_v13, %v406_v13 }
 0x12b   : > { %v511_v50 = vadd.f32 %v510_v38, %v461_v4  ;;  %v542_v58 = vadd.f32 %v541_v46, %v462_v5  ;;  %v409_v38 = vsub.f32 %v1412_v20, %v1518_v18  ;;  %v410_v46 = vsub.f32 %v1416_v24, %v1518_v18 }
 0x12c   : > { %v471_v34 = vmul.f32 %v407_v6, %v407_v6  ;;  %v472_v42 = vmul.f32 %v408_v26, %v408_v26 }
 0x12d   : > { %v512_v62 = vadd.f32 %v511_v50, %v463_v7  ;;  %v543_v10 = vadd.f32 %v542_v58, %v464_v9  ;;  %v411_v50 = vsub.f32 %v1420_v28, %v1518_v18  ;;  %v412_v58 = vsub.f32 %v1424_v32, %v1518_v18 }
 0x12e   : > { %v473_v11 = vmul.f32 %v409_v38, %v409_v38  ;;  %v474_v13 = vmul.f32 %v410_v46, %v410_v46 }
 0x12f   : > { %v513_v4 = vadd.f32 %v512_v62, %v465_v54  ;;  %v544_v5 = vadd.f32 %v543_v10, %v466_v56  ;;  %v413_v62 = vsub.f32 %v1428_v36, %v1518_v18  ;;  %v414_v10 = vsub.f32 %v1432_v40, %v1518_v18 }
 0x130   : > { %v475_v6 = vmul.f32 %v411_v50, %v411_v50  ;;  %v476_v26 = vmul.f32 %v412_v58, %v412_v58 }
 0x131   : > { %v514_v7 = vadd.f32 %v513_v4, %v467_v0  ;;  %v545_v9 = vadd.f32 %v544_v5, %v468_v1  ;;  %v415_v4 = vsub.f32 %v1436_v44, %v1518_v18  ;;  %v416_v5 = vsub.f32 %v1440_v48, %v1518_v18  ;;  %v2255_v44 = vld [vmem:[#allocation24_spill] sm:$0xff] }
 0x132   : > { %v477_v38 = vmul.f32 %v413_v62, %v413_v62  ;;  %v478_v46 = vmul.f32 %v414_v10, %v414_v10  ;;  %v420_v48 = vsub.f32 %v2255_v44, %v1518_v18 }
 0x133   : > { %v515_v54 = vadd.f32 %v514_v7, %v469_v2  ;;  %v546_v56 = vadd.f32 %v545_v9, %v470_v3  ;;  %v417_v7 = vsub.f32 %v1444_v52, %v1518_v18  ;;  %v2253_v9 = vld [vmem:[#allocation22_spill] sm:$0xff]  ;;  %v479_v50 = vmul.f32 %v415_v4, %v415_v4 }
 0x134   : > { %v418_v40 = vsub.f32 %v2253_v9, %v1518_v18  ;;  %v480_v58 = vmul.f32 %v416_v5, %v416_v5  ;;  %v2257_v52 = vld [vmem:[#allocation26_spill] sm:$0xff]  ;;  %v484_v5 = vmul.f32 %v420_v48, %v420_v48 }
 0x135   : > { %v516_v0 = vadd.f32 %v515_v54, %v471_v34  ;;  %v547_v1 = vadd.f32 %v546_v56, %v472_v42  ;;  %v2254_v54 = vld [vmem:[#allocation23_spill] sm:$0xff]  ;;  %v422_v9 = vsub.f32 %v2257_v52, %v1518_v18  ;;  %v481_v62 = vmul.f32 %v417_v7, %v417_v7 }
 0x136   : > { %v419_v56 = vsub.f32 %v2254_v54, %v1518_v18  ;;  %v482_v10 = vmul.f32 %v418_v40, %v418_v40  ;;  %v2259_v54 = vld [vmem:[#allocation28_spill] sm:$0xff] }
 0x137   : > { %v517_v2 = vadd.f32 %v516_v0, %v473_v11  ;;  %v548_v3 = vadd.f32 %v547_v1, %v474_v13  ;;  %v2256_v0 = vld [vmem:[#allocation25_spill] sm:$0xff]  ;;  %v424_v44 = vsub.f32 %v2259_v54, %v1518_v18  ;;  %v486_v40 = vmul.f32 %v422_v9, %v422_v9 }
 0x138   : > { %v421_v1 = vsub.f32 %v2256_v0, %v1518_v18  ;;  %v483_v4 = vmul.f32 %v419_v56, %v419_v56  ;;  %v2261_v0 = vld [vmem:[#allocation30_spill] sm:$0xff] }
 0x139   : > { %v518_v34 = vadd.f32 %v517_v2, %v475_v6  ;;  %v549_v42 = vadd.f32 %v548_v3, %v476_v26  ;;  %v2258_v2 = vld [vmem:[#allocation27_spill] sm:$0xff]  ;;  %v426_v52 = vsub.f32 %v2261_v0, %v1518_v18  ;;  %v488_v48 = vmul.f32 %v424_v44, %v424_v44 }
 0x13a   : > { %v423_v3 = vsub.f32 %v2258_v2, %v1518_v18  ;;  %v485_v7 = vmul.f32 %v421_v1, %v421_v1  ;;  %v2263_v2 = vld [vmem:[#allocation32_spill] sm:$0xff] }
 0x13b   : > { %v519_v11 = vadd.f32 %v518_v34, %v477_v38  ;;  %v550_v13 = vadd.f32 %v549_v42, %v478_v46  ;;  %v2260_v34 = vld [vmem:[#allocation29_spill] sm:$0xff]  ;;  %v428_v54 = vsub.f32 %v2263_v2, %v1518_v18  ;;  %v490_v9 = vmul.f32 %v426_v52, %v426_v52 }
 0x13c   : > { %v425_v42 = vsub.f32 %v2260_v34, %v1518_v18  ;;  %v487_v56 = vmul.f32 %v423_v3, %v423_v3 }
 0x13d   : > { %v520_v6 = vadd.f32 %v519_v11, %v479_v50  ;;  %v551_v26 = vadd.f32 %v550_v13, %v480_v58  ;;  %v2262_v11 = vld [vmem:[#allocation31_spill] sm:$0xff]  ;;  %v492_v44 = vmul.f32 %v428_v54, %v428_v54 }
 0x13e   : > { %v427_v13 = vsub.f32 %v2262_v11, %v1518_v18  ;;  %v489_v1 = vmul.f32 %v425_v42, %v425_v42 }
 0x13f   : > { %v521_v38 = vadd.f32 %v520_v6, %v481_v62  ;;  %v552_v46 = vadd.f32 %v551_v26, %v482_v10  ;;  %v429_v6 = vsub.f32 %v1492_v60, %v1518_v18  ;;  %v430_v26 = vsub.f32 %v1496_v14, %v1518_v18  ;;  %v2265_v60 = vld [vmem:[#allocation38_spill] sm:$0xff] }
 0x140   : > { %v491_v3 = vmul.f32 %v427_v13, %v427_v13  ;;  %v434_v14 = vsub.f32 %v2265_v60, %v1518_v18 }
 0x141   : > { %v522_v50 = vadd.f32 %v521_v38, %v483_v4  ;;  %v553_v58 = vadd.f32 %v552_v46, %v484_v5  ;;  %v431_v38 = vsub.f32 %v1500_v22, %v1518_v18  ;;  %v432_v46 = vsub.f32 %v1504_v30, %v1518_v18 }
 0x142   : > { %v493_v42 = vmul.f32 %v429_v6, %v429_v6  ;;  %v494_v52 = vmul.f32 %v430_v26, %v430_v26  ;;  %v498_v30 = vmul.f32 %v434_v14, %v434_v14  ;;  %v569_v14 = vld [vmem:[%s2169_s2] sm:$0xff] }
 0x143   : > { %v523_v62 = vadd.f32 %v522_v50, %v485_v7  ;;  %v554_v10 = vadd.f32 %v553_v58, %v486_v40  ;;  %v2264_v50 = vld [vmem:[#allocation37_spill] sm:$0xff] }
 0x144   : > { %v433_v58 = vsub.f32 %v2264_v50, %v1518_v18 }
 0x145   : > { %v524_v4 = vadd.f32 %v523_v62, %v487_v56  ;;  %v555_v5 = vadd.f32 %v554_v10, %v488_v48  ;;  %v495_v62 = vmul.f32 %v431_v38, %v431_v38  ;;  %v496_v10 = vmul.f32 %v432_v46, %v432_v46  ;;  %v567_v38 = vld [vmem:[%s2168_s1] sm:$0xff] }
 0x146   : > { %v497_v11 = vmul.f32 %v433_v58, %v433_v58 }
 0x147   : > { %v525_v7 = vadd.f32 %v524_v4, %v489_v1  ;;  %v556_v40 = vadd.f32 %v555_v5, %v490_v9  ;;  %v1114_v5 = vmov 0  }
 0x148   : > { %993 = vset.pattern.permute.xlu1 %v1114_v5  ;;  %994 = vset.pattern.permute.xlu0 %v1114_v5  ;;  %v2275_v5 = vld [vmem:[#allocation17_spill] sm:$0xff] }
 0x149   : > { %v526_v56 = vadd.f32 %v525_v7, %v491_v3  ;;  %v557_v48 = vadd.f32 %v556_v40, %v492_v44  ;;  %v2267_v44 = vld [vmem:[#allocation9_spill] sm:$0xff]  ;;  %v2268_v40 = vld [vmem:[#allocation10_spill] sm:$0xff] }
 0x14b   : > { %v527_v22 = vadd.f32 %v526_v56, %v493_v42  ;;  %v558_v2 = vadd.f32 %v557_v48, %v494_v52  ;;  %v2269_v42 = vld [vmem:[#allocation11_spill] sm:$0xff]  ;;  %v2271_v48 = vld [vmem:[#allocation13_spill] sm:$0xff] }
 0x14d   : > { %v528_v13 = vadd.f32 %v527_v22, %v495_v62  ;;  %v559_v54 = vadd.f32 %v558_v2, %v496_v10  ;;  %v2272_v10 = vld [vmem:[#allocation14_spill] sm:$0xff] }
 0x14f   : > { %v529_v1 = vadd.f32 %v528_v13, %v497_v11  ;;  %v560_v9 = vadd.f32 %v559_v54, %v498_v30  ;;  %v2273_v54 = vld [vmem:[#allocation15_spill] sm:$0xff] }
 0x151   : > { %v561_v4 = vadd.f32 %v560_v9, %v529_v1  ;;  %v2274_v9 = vld [vmem:[#allocation16_spill] sm:$0xff] }
 0x153   : > { %562 = vadd.xlane.f32.xlu0 %v561_v4 }
 0x1e0   : > { %v563_v60 = vpop.xlane.xlu0 %562 }
 0x1e1   : > { %v564_v6 = vmul.f32 0.00012207031, %v563_v60  ;;  %v2266_v60 = vld [vmem:[#allocation8_spill] sm:$0xff] }
 0x1e3   : > { %v565_v26 = vadd.f32 1e-05, %v564_v6 }
 0x1e5   : > { %995 = vrsqrt.f32 %v565_v26 }
 0x1ef   : > { %v996_v46 = vpop.eup %995 }
 0x1f0   : > { %v568_v3 = vmul.f32 %v996_v46, %v567_v38 }
 0x1f2   : > { %574 = vperm.xlu1 %993, %v568_v3   ;;  %v570_v22 = vmul.f32 %v568_v3, %v1518_v18  ;;  %v2270_v18 = vld [vmem:[#allocation12_spill] sm:$0xff] }
 0x1f4   : > { %v571_v30 = vsub.f32 %v569_v14, %v570_v22  ;;  %v2276_v22 = vld [vmem:[#allocation18_spill] sm:$0xff] }
 0x1f6   : > { %643 = vperm.xlu1 %993, %v571_v30   ;;  %v2277_v30 = vld [vmem:[#allocation19_spill] sm:$0xff] }
 0x271   : > { %v1655_v2 = vpop.permute.xlu1 %574 }
 0x272   : > { %v1659_v11 = vmul.f32 %v1655_v2, %v2266_v60  ;;  %v1663_v7 = vmul.f32 %v1655_v2, %v2267_v44  ;;  %v1667_v58 = vmul.f32 %v1655_v2, %v2268_v40  ;;  %v1671_v52 = vmul.f32 %v1655_v2, %v2269_v42  ;;  %v2278_v60 = vld [vmem:[#allocation20_spill] sm:$0xff]  ;;  %v2279_v44 = vld [vmem:[#allocation21_spill] sm:$0xff]  ;;  %v2280_v40 = vld [vmem:[#allocation22_spill] sm:$0xff] }
 0x273   : > { %v1675_v56 = vmul.f32 %v1655_v2, %v2270_v18  ;;  %v1679_v62 = vmul.f32 %v1655_v2, %v2271_v48  ;;  %v1683_v13 = vmul.f32 %v1655_v2, %v2272_v10  ;;  %v1687_v1 = vmul.f32 %v1655_v2, %v2273_v54  ;;  %v2281_v42 = vld [vmem:[#allocation23_spill] sm:$0xff]  ;;  %v2282_v48 = vld [vmem:[#allocation24_spill] sm:$0xff]  ;;  %v2283_v54 = vld [vmem:[#allocation25_spill] sm:$0xff] }
 0x274   : > { %v1691_v4 = vmul.f32 %v1655_v2, %v2274_v9  ;;  %v1695_v6 = vmul.f32 %v1655_v2, %v2275_v5  ;;  %v1699_v26 = vmul.f32 %v1655_v2, %v1300_v15  ;;  %v1703_v38 = vmul.f32 %v1655_v2, %v1304_v17  ;;  %v2285_v5 = vld [vmem:[#allocation26_spill] sm:$0xff] }
 0x275   : > { %v1707_v46 = vmul.f32 %v1655_v2, %v1308_v19  ;;  %v1711_v3 = vmul.f32 %v1655_v2, %v1312_v21  ;;  %v1715_v14 = vmul.f32 %v1655_v2, %v1316_v23  ;;  %v1719_v15 = vmul.f32 %v1655_v2, %v1320_v25 }
 0x276   : > { %v1723_v17 = vmul.f32 %v1655_v2, %v1324_v27  ;;  %v1727_v19 = vmul.f32 %v1655_v2, %v1328_v29  ;;  %v1731_v21 = vmul.f32 %v1655_v2, %v1332_v31  ;;  %v1735_v23 = vmul.f32 %v1655_v2, %v1336_v33 }
 0x277   : > { %v1739_v25 = vmul.f32 %v1655_v2, %v1340_v35  ;;  %v1743_v27 = vmul.f32 %v1655_v2, %v1344_v37  ;;  %v1747_v29 = vmul.f32 %v1655_v2, %v1348_v39  ;;  %v1751_v31 = vmul.f32 %v1655_v2, %v1352_v41 }
 0x278   : > { %v1755_v33 = vmul.f32 %v1655_v2, %v1356_v43  ;;  %v1759_v35 = vmul.f32 %v1655_v2, %v1360_v45  ;;  %v1763_v37 = vmul.f32 %v1655_v2, %v1364_v47  ;;  %v1767_v39 = vmul.f32 %v1655_v2, %v1368_v49 }
 0x279   : > { %v1771_v41 = vmul.f32 %v1655_v2, %v1372_v51  ;;  %v1775_v43 = vmul.f32 %v1655_v2, %v1376_v53  ;;  %v1779_v45 = vmul.f32 %v1655_v2, %v1380_v55  ;;  %v1783_v47 = vmul.f32 %v1655_v2, %v1384_v57 }
 0x27a   : > { %v1787_v49 = vmul.f32 %v1655_v2, %v1388_v59  ;;  %v1791_v51 = vmul.f32 %v1655_v2, %v1392_v61  ;;  %v1795_v53 = vmul.f32 %v1655_v2, %v1396_v63  ;;  %v1799_v55 = vmul.f32 %v1655_v2, %v1400_v8 }
 0x27b   : > { %v1803_v57 = vmul.f32 %v1655_v2, %v1404_v12  ;;  %v1807_v59 = vmul.f32 %v1655_v2, %v1408_v16  ;;  %v1811_v61 = vmul.f32 %v1655_v2, %v1412_v20  ;;  %v1815_v63 = vmul.f32 %v1655_v2, %v1416_v24 }
 0x27c   : > { %v1819_v8 = vmul.f32 %v1655_v2, %v1420_v28  ;;  %v1823_v12 = vmul.f32 %v1655_v2, %v1424_v32  ;;  %v1827_v16 = vmul.f32 %v1655_v2, %v1428_v36  ;;  %v1831_v20 = vmul.f32 %v1655_v2, %v2276_v22 }
 0x27d   : > { %v1835_v24 = vmul.f32 %v1655_v2, %v2277_v30  ;;  %v1839_v28 = vmul.f32 %v1655_v2, %v2278_v60  ;;  %v1843_v32 = vmul.f32 %v1655_v2, %v2279_v44  ;;  %v1847_v36 = vmul.f32 %v1655_v2, %v2280_v40  ;;  %v2287_v30 = vld [vmem:[#allocation27_spill] sm:$0xff]  ;;  %v2289_v44 = vld [vmem:[#allocation28_spill] sm:$0xff] }
 0x27e   : > { %v1851_v18 = vmul.f32 %v1655_v2, %v2281_v42  ;;  %v1855_v10 = vmul.f32 %v1655_v2, %v2282_v48  ;;  %v1859_v9 = vmul.f32 %v1655_v2, %v2283_v54  ;;  %v1863_v22 = vmul.f32 %v1655_v2, %v2285_v5  ;;  %v1881_v54 = vpop.permute.xlu1 %643  ;;  %v2293_v5 = vld [vmem:[#allocation31_spill] sm:$0xff] }
 0x27f   : > { %v1867_v60 = vmul.f32 %v1655_v2, %v2287_v30  ;;  %v1871_v40 = vmul.f32 %v1655_v2, %v2289_v44  ;;  %v1875_v42 = vmul.f32 %v1655_v2, %v2260_v34  ;;  %v1879_v48 = vmul.f32 %v1655_v2, %v2261_v0  ;;  %v2294_v30 = vld [vmem:[#allocation32_spill] sm:$0xff]  ;;  %v2296_v44 = vld [vmem:[#allocation33_spill] sm:$0xff]  ;;  %v2297_v34 = vld [vmem:[#allocation34_spill] sm:$0xff] }
 0x280   : > { %2284 = vst [vmem:[#allocation29_spill] sm:$0xff] %v1859_v9  ;;  %2286 = vst [vmem:[#allocation30_spill] sm:$0xff] %v1863_v22  ;;  %v1885_v22 = vmul.f32 %v1655_v2, %v2293_v5  ;;  %v2298_v0 = vld [vmem:[#allocation35_spill] sm:$0xff]  ;;  %v2300_v9 = vld [vmem:[#allocation36_spill] sm:$0xff] }
 0x281   : > { %2288 = vst [vmem:[#allocation37_spill] sm:$0xff] %v1867_v60  ;;  %2290 = vst [vmem:[#allocation8_spill] sm:$0xff] %v1871_v40  ;;  %v1889_v60 = vmul.f32 %v1655_v2, %v2294_v30  ;;  %v1893_v40 = vmul.f32 %v1655_v2, %v2296_v44  ;;  %v1905_v5 = vmul.f32 %v1655_v2, %v2300_v9 }
 0x282   : > { %2291 = vst [vmem:[#allocation9_spill] sm:$0xff] %v1875_v42  ;;  %2292 = vst [vmem:[#allocation10_spill] sm:$0xff] %v1879_v48  ;;  %v1897_v42 = vmul.f32 %v1655_v2, %v2297_v34  ;;  %v1901_v48 = vmul.f32 %v1655_v2, %v2298_v0  ;;  %v1909_v30 = vmul.f32 %v1655_v2, %v2264_v50 }
 0x283   : > { %2295 = vst [vmem:[#allocation11_spill] sm:$0xff] %v1889_v60  ;;  %v2302_v60 = vld [vmem:[#allocation38_spill] sm:$0xff]  ;;  %v646_v34 = vadd.f32 %v1881_v54, %v1659_v11  ;;  %v647_v0 = vadd.f32 %v1881_v54, %v1663_v7  ;;  %v649_v9 = vadd.f32 %v1881_v54, %v1671_v52  ;;  %v650_v50 = vadd.f32 %v1881_v54, %v1675_v56 }
 0x284   : > { %2299 = vst [vmem:[#allocation12_spill] sm:$0xff] %v1901_v48  ;;  %2301 = vst [vmem:[#allocation13_spill] sm:$0xff] %v1909_v30  ;;  %v1913_v44 = vmul.f32 %v1655_v2, %v2302_v60  ;;  %v648_v48 = vadd.f32 %v1881_v54, %v1667_v58  ;;  %v651_v30 = vadd.f32 %v1881_v54, %v1679_v62 }
 0x285   : > { %v652_v2 = vadd.f32 %v1881_v54, %v1683_v13  ;;  %v653_v11 = vadd.f32 %v1881_v54, %v1687_v1  ;;  %v654_v7 = vadd.f32 %v1881_v54, %v1691_v4  ;;  %v655_v58 = vadd.f32 %v1881_v54, %v1695_v6  ;;  %710 = vst [vmem:[%s1941_s10] sm:$0xff] %v646_v34 }
 0x286   : > { %v656_v52 = vadd.f32 %v1881_v54, %v1699_v26  ;;  %v657_v56 = vadd.f32 %v1881_v54, %v1703_v38  ;;  %711 = vst [vmem:[%s1941_s10 + $0x8] sm:$0xff] %v647_v0  ;;  %712 = vst [vmem:[%s1941_s10 + $0x10] sm:$0xff] %v648_v48  ;;  %v658_v62 = vadd.f32 %v1881_v54, %v1707_v46 }
 0x287   : > { %713 = vst [vmem:[%s1941_s10 + $0x18] sm:$0xff] %v649_v9  ;;  %v659_v13 = vadd.f32 %v1881_v54, %v1711_v3  ;;  %v660_v1 = vadd.f32 %v1881_v54, %v1715_v14  ;;  %v661_v4 = vadd.f32 %v1881_v54, %v1719_v15  ;;  %714 = vst [vmem:[%s1941_s10 + $0x20] sm:$0xff] %v650_v50 }
 0x288   : > { %715 = vst [vmem:[%s1941_s10 + $0x28] sm:$0xff] %v651_v30  ;;  %716 = vst [vmem:[%s1941_s10 + $0x30] sm:$0xff] %v652_v2  ;;  %v662_v6 = vadd.f32 %v1881_v54, %v1723_v17  ;;  %v663_v26 = vadd.f32 %v1881_v54, %v1727_v19  ;;  %v664_v38 = vadd.f32 %v1881_v54, %v1731_v21  ;;  %v2306_v60 = vld [vmem:[#allocation8_spill] sm:$0xff] }
 0x289   : > { %717 = vst [vmem:[%s1941_s10 + $0x38] sm:$0xff] %v653_v11  ;;  %v665_v46 = vadd.f32 %v1881_v54, %v1735_v23  ;;  %718 = vst [vmem:[%s1941_s10 + $0x40] sm:$0xff] %v654_v7  ;;  %v666_v3 = vadd.f32 %v1881_v54, %v1739_v25  ;;  %v667_v14 = vadd.f32 %v1881_v54, %v1743_v27  ;;  %v2307_v48 = vld [vmem:[#allocation9_spill] sm:$0xff]  ;;  %v2308_v34 = vld [vmem:[#allocation10_spill] sm:$0xff] }
 0x28a   : > { %719 = vst [vmem:[%s1941_s10 + $0x48] sm:$0xff] %v655_v58  ;;  %720 = vst [vmem:[%s1941_s10 + $0x50] sm:$0xff] %v656_v52  ;;  %v668_v15 = vadd.f32 %v1881_v54, %v1747_v29  ;;  %v669_v17 = vadd.f32 %v1881_v54, %v1751_v31  ;;  %v670_v19 = vadd.f32 %v1881_v54, %v1755_v33  ;;  %v2309_v50 = vld [vmem:[#allocation11_spill] sm:$0xff] }
 0x28b   : > { %721 = vst [vmem:[%s1941_s10 + $0x58] sm:$0xff] %v657_v56  ;;  %722 = vst [vmem:[%s1941_s10 + $0x60] sm:$0xff] %v658_v62  ;;  %v671_v21 = vadd.f32 %v1881_v54, %v1759_v35  ;;  %v672_v23 = vadd.f32 %v1881_v54, %v1763_v37  ;;  %v673_v25 = vadd.f32 %v1881_v54, %v1767_v39  ;;  %v2311_v58 = vld [vmem:[#allocation13_spill] sm:$0xff] }
 0x28c   : > { %723 = vst [vmem:[%s1941_s10 + $0x68] sm:$0xff] %v659_v13  ;;  %724 = vst [vmem:[%s1941_s10 + $0x70] sm:$0xff] %v660_v1  ;;  %v674_v27 = vadd.f32 %v1881_v54, %v1771_v41  ;;  %v675_v29 = vadd.f32 %v1881_v54, %v1775_v43  ;;  %v676_v31 = vadd.f32 %v1881_v54, %v1779_v45 }
 0x28d   : > { %725 = vst [vmem:[%s1941_s10 + $0x78] sm:$0xff] %v661_v4  ;;  %726 = vst [vmem:[%s1941_s10 + $0x80] sm:$0xff] %v662_v6  ;;  %v677_v33 = vadd.f32 %v1881_v54, %v1783_v47  ;;  %v678_v35 = vadd.f32 %v1881_v54, %v1787_v49  ;;  %v679_v37 = vadd.f32 %v1881_v54, %v1791_v51 }
 0x28e   : > { %727 = vst [vmem:[%s1941_s10 + $0x88] sm:$0xff] %v663_v26  ;;  %728 = vst [vmem:[%s1941_s10 + $0x90] sm:$0xff] %v664_v38  ;;  %v680_v39 = vadd.f32 %v1881_v54, %v1795_v53  ;;  %v681_v41 = vadd.f32 %v1881_v54, %v1799_v55  ;;  %v682_v43 = vadd.f32 %v1881_v54, %v1803_v57 }
 0x28f   : > { %729 = vst [vmem:[%s1941_s10 + $0x98] sm:$0xff] %v665_v46  ;;  %730 = vst [vmem:[%s1941_s10 + $0xa0] sm:$0xff] %v666_v3  ;;  %v683_v45 = vadd.f32 %v1881_v54, %v1807_v59  ;;  %v684_v47 = vadd.f32 %v1881_v54, %v1811_v61  ;;  %v685_v49 = vadd.f32 %v1881_v54, %v1815_v63 }
 0x290   : > { %731 = vst [vmem:[%s1941_s10 + $0xa8] sm:$0xff] %v667_v14  ;;  %732 = vst [vmem:[%s1941_s10 + $0xb0] sm:$0xff] %v668_v15  ;;  %v686_v51 = vadd.f32 %v1881_v54, %v1819_v8  ;;  %v687_v53 = vadd.f32 %v1881_v54, %v1823_v12  ;;  %v688_v55 = vadd.f32 %v1881_v54, %v1827_v16 }
 0x291   : > { %733 = vst [vmem:[%s1941_s10 + $0xb8] sm:$0xff] %v669_v17  ;;  %734 = vst [vmem:[%s1941_s10 + $0xc0] sm:$0xff] %v670_v19  ;;  %v689_v57 = vadd.f32 %v1881_v54, %v1831_v20  ;;  %v690_v59 = vadd.f32 %v1881_v54, %v1835_v24  ;;  %v691_v61 = vadd.f32 %v1881_v54, %v1839_v28  ;;  %v2303_v20 = vld [vmem:[#allocation29_spill] sm:$0xff]  ;;  %v2304_v28 = vld [vmem:[#allocation30_spill] sm:$0xff] }
 0x292   : > { %735 = vst [vmem:[%s1941_s10 + $0xc8] sm:$0xff] %v671_v21  ;;  %736 = vst [vmem:[%s1941_s10 + $0xd0] sm:$0xff] %v672_v23  ;;  %v692_v63 = vadd.f32 %v1881_v54, %v1843_v32  ;;  %v693_v8 = vadd.f32 %v1881_v54, %v1847_v36  ;;  %v694_v12 = vadd.f32 %v1881_v54, %v1851_v18  ;;  %v2305_v36 = vld [vmem:[#allocation37_spill] sm:$0xff] }
 0x293   : > { %737 = vst [vmem:[%s1941_s10 + $0xd8] sm:$0xff] %v673_v25  ;;  %738 = vst [vmem:[%s1941_s10 + $0xe0] sm:$0xff] %v674_v27  ;;  %v695_v16 = vadd.f32 %v1881_v54, %v1855_v10  ;;  %v696_v24 = vadd.f32 %v1881_v54, %v2303_v20  ;;  %v697_v32 = vadd.f32 %v1881_v54, %v2304_v28 }
 0x294   : > { %739 = vst [vmem:[%s1941_s10 + $0xe8] sm:$0xff] %v675_v29  ;;  %740 = vst [vmem:[%s1941_s10 + $0xf0] sm:$0xff] %v676_v31  ;;  %v698_v18 = vadd.f32 %v1881_v54, %v2305_v36  ;;  %v699_v10 = vadd.f32 %v1881_v54, %v2306_v60  ;;  %v700_v30 = vadd.f32 %v1881_v54, %v2307_v48 }
 0x295   : > { %741 = vst [vmem:[%s1941_s10 + $0xf8] sm:$0xff] %v677_v33  ;;  %742 = vst [vmem:[%s1941_s10 + $0x100] sm:$0xff] %v678_v35  ;;  %v701_v0 = vadd.f32 %v1881_v54, %v2308_v34  ;;  %v702_v9 = vadd.f32 %v1881_v54, %v1885_v22  ;;  %v703_v2 = vadd.f32 %v1881_v54, %v2309_v50  ;;  %v2310_v22 = vld [vmem:[#allocation12_spill] sm:$0xff] }
 0x296   : > { %743 = vst [vmem:[%s1941_s10 + $0x108] sm:$0xff] %v679_v37  ;;  %744 = vst [vmem:[%s1941_s10 + $0x110] sm:$0xff] %v680_v39  ;;  %v704_v11 = vadd.f32 %v1881_v54, %v1893_v40  ;;  %v705_v7 = vadd.f32 %v1881_v54, %v1897_v42  ;;  %v706_v40 = vadd.f32 %v1881_v54, %v2310_v22 }
 0x297   : > { %745 = vst [vmem:[%s1941_s10 + $0x118] sm:$0xff] %v681_v41  ;;  %746 = vst [vmem:[%s1941_s10 + $0x120] sm:$0xff] %v682_v43  ;;  %v707_v42 = vadd.f32 %v1881_v54, %v1905_v5  ;;  %v708_v52 = vadd.f32 %v1881_v54, %v2311_v58  ;;  %v709_v56 = vadd.f32 %v1881_v54, %v1913_v44 }
 0x298   : > { %747 = vst [vmem:[%s1941_s10 + $0x128] sm:$0xff] %v683_v45  ;;  %748 = vst [vmem:[%s1941_s10 + $0x130] sm:$0xff] %v684_v47 }
 0x299   : > { %749 = vst [vmem:[%s1941_s10 + $0x138] sm:$0xff] %v685_v49  ;;  %750 = vst [vmem:[%s1941_s10 + $0x140] sm:$0xff] %v686_v51 }
 0x29a   : > { %751 = vst [vmem:[%s1941_s10 + $0x148] sm:$0xff] %v687_v53  ;;  %752 = vst [vmem:[%s1941_s10 + $0x150] sm:$0xff] %v688_v55 }
 0x29b   : > { %753 = vst [vmem:[%s1941_s10 + $0x158] sm:$0xff] %v689_v57  ;;  %754 = vst [vmem:[%s1941_s10 + $0x160] sm:$0xff] %v690_v59 }
 0x29c   : > { %755 = vst [vmem:[%s1941_s10 + $0x168] sm:$0xff] %v691_v61  ;;  %756 = vst [vmem:[%s1941_s10 + $0x170] sm:$0xff] %v692_v63 }
 0x29d   : > { %757 = vst [vmem:[%s1941_s10 + $0x178] sm:$0xff] %v693_v8  ;;  %758 = vst [vmem:[%s1941_s10 + $0x180] sm:$0xff] %v694_v12 }
 0x29e   : > { %759 = vst [vmem:[%s1941_s10 + $0x188] sm:$0xff] %v695_v16  ;;  %760 = vst [vmem:[%s1941_s10 + $0x190] sm:$0xff] %v696_v24 }
 0x29f   : > { %761 = vst [vmem:[%s1941_s10 + $0x198] sm:$0xff] %v697_v32  ;;  %762 = vst [vmem:[%s1941_s10 + $0x1a0] sm:$0xff] %v698_v18 }
 0x2a0   : > { %763 = vst [vmem:[%s1941_s10 + $0x1a8] sm:$0xff] %v699_v10  ;;  %764 = vst [vmem:[%s1941_s10 + $0x1b0] sm:$0xff] %v700_v30 }
 0x2a1   : > { %765 = vst [vmem:[%s1941_s10 + $0x1b8] sm:$0xff] %v701_v0  ;;  %766 = vst [vmem:[%s1941_s10 + $0x1c0] sm:$0xff] %v702_v9 }
 0x2a2   : > { %767 = vst [vmem:[%s1941_s10 + $0x1c8] sm:$0xff] %v703_v2  ;;  %768 = vst [vmem:[%s1941_s10 + $0x1d0] sm:$0xff] %v704_v11 }
 0x2a3   : > { %769 = vst [vmem:[%s1941_s10 + $0x1d8] sm:$0xff] %v705_v7  ;;  %770 = vst [vmem:[%s1941_s10 + $0x1e0] sm:$0xff] %v706_v40 }
 0x2a4   : > { %771 = vst [vmem:[%s1941_s10 + $0x1e8] sm:$0xff] %v707_v42  ;;  %772 = vst [vmem:[%s1941_s10 + $0x1f0] sm:$0xff] %v708_v52 }
 0x2a5   : > { %773 = vst [vmem:[%s1941_s10 + $0x1f8] sm:$0xff] %v709_v56 }
 0x2a6   : > { %1040 = shalt.err (!%p1037_p5)
}
 0x2a7   : > { %s1041_s19 = scalar_lea.hbm %s2096_s29, 8192  ;;  %s1045_s6 = scalar_lea.hbm %s2170_s3, 16384 }
 0x2a8   : > { %p1042_p4 = scmp.ne.s32.totalorder %s2096_s29, %s1041_s19  ;;  %p1046_p12 = scmp.lt.u32.totalorder %s2096_s29, %s2170_s3 }
 0x2a9   : > { %p1047_p1 = scmp.lt.u32.totalorder %s1045_s6, %s1041_s19  ;;  %p1049_p8 = scmp.lt.u32.totalorder %s1041_s19, %s2096_s29 }
 0x2aa   : > { %p1043_p7 = pnand %p1042_p4, %p2312_p9 }
 0x2ab   : > { %p1048_p3 = por %p1047_p1, %p1046_p12 }
 0x2ac   : > { %p1044_p10 = pneg %p1043_p7 }
 0x2ad   : > { %p1050_p11 = por %p1049_p8, %p1048_p3 }
 0x2af   : > { %p1051_p0 = pnand %p1050_p11, %p1044_p10 }
 0x2b1   : > { %1054 = shalt.err (!%p1051_p0)
}
 0x2b2   : > { %s1116_s10 = smov 256   ;;  %s1117_s22 = smov 16  }
 0x2b3   : > { %928 = dma.vmem_to_hbm [thread:$0]  (%p2312_p9), %s2098_s23, 8192, %s2096_s29, %s775_s30, %s1116_s10, %s1116_s10, %s1117_s22  }
 0x2b4 PF: > { %s805_s15 = sand.u32 1, %s1089_s12   ;;  %p2313_p6 = scmp.ne.s32.totalorder %s2219_s27, 0 }
 0x2b5   : > { %p2314_p13 = scmp.ge.s32.totalorder %s1109_s17, 2  ;;  %s806_s28 = scalar_lea.sflag [#allocation4], %s805_s15 }
 0x2b7   : > { %p935_p2 = pnand %p2314_p13, %p2313_p6 }
 0x2b9   : > { %1084 = dma.done.wait (!%p935_p2), %s806_s28, 8192  }
 0x2ba   : > { %1086 = vsyncadd (!%p935_p2), %s806_s28, 4294959104  ;;  %s19_s17 = sadd.s32 1, %s1109_s17   ;;  %s2315_s12 = smov %s1093_s13 }
 0x2bb   : > { %p16_p5 = scmp.ge.s32.totalorder %s19_s17, 4   ;;  %s2316_s13 = smov %s1097_s14 }
 0x2bc   : > { %s2317_s14 = smov %s1194_s26  ;;  %s2318_s15 = smov %s1105_s16 }
 0x2bd   : > { %s2319_s16 = smov %s2321_s20  ;;  %18 = sbr.rel (!%p16_p5) target bundleno = 6 (0x6), region = 83 }
 0x2c4   :  { %811 = vsyncpa [#allocation3], 1 }
 0x2c5   :  { %813 = vsyncpa [#allocation3 + $0x1], 1 }
 0x2c6   :  { %814 = vsyncpa [#allocation4], 1 }
 0x2c7   :  { %816 = vsyncpa [#allocation4 + $0x1], 1 }

</bundles_post_ra>
